<compile_context>
chip_gen: v7x
topology: tpu7x:2x2x1
jax: 0.10.0
libtpu: 0.0.40
codegen_flags: <defaults>
</compile_context>

<pallas_src>
import math
import functools

import jax
import jax.numpy as jnp
from jax.experimental import pallas as pl
from jax.experimental.pallas import tpu as pltpu


def make_pe_table(seq_len: int, d_model: int) -> jnp.ndarray:
    """Sinusoidal positional-encoding buffer, identical to the PyTorch __init__."""
    assert d_model % 2 == 0, "sinusoidal PE (like the PyTorch module) needs even d_model"
    position = jnp.arange(seq_len, dtype=jnp.float32)[:, None]              # (S, 1)
    div_term = jnp.exp(
        jnp.arange(0, d_model, 2, dtype=jnp.float32) * (-math.log(10000.0) / d_model)
    )                                                                        # (D/2,)
    pe = jnp.zeros((seq_len, d_model), dtype=jnp.float32)
    pe = pe.at[:, 0::2].set(jnp.sin(position * div_term))
    pe = pe.at[:, 1::2].set(jnp.cos(position * div_term))
    return pe                                                                # (S, D)


# ----------------------------- kernels ---------------------------------------

def _pe_add_kernel(x_ref, pe_ref, o_ref):
    # Shapes match exactly (no broadcast): (TS, D)+(TS, D) or (1, S*D)+(1, S*D).
    o_ref[...] = (x_ref[...] + pe_ref[...]).astype(o_ref.dtype)


def _pe_add_dropout_kernel(x_ref, pe_ref, bits_ref, o_ref, *, threshold, scale):
    y = x_ref[...] + pe_ref[...]
    # Inverted dropout via integer threshold: keep iff bits >= p * 2^32.
    keep = bits_ref[...] >= jnp.uint32(threshold)
    o_ref[...] = jnp.where(keep, y * scale, 0.0).astype(o_ref.dtype)


# ----------------------------- wrapper ----------------------------------------

def _choose_seq_tile(S: int, D: int, itemsize: int, target_bytes: int = 1 << 20) -> int:
    """Largest multiple-of-8 divisor of S with TS*D*itemsize <= target (else S)."""
    if S % 8 != 0:
        return S                       # must use full dim (satisfies layout rule)
    best = S
    for cand in range(S, 0, -8):
        if S % cand != 0:
            continue
        best = cand
        if cand * D * itemsize <= target_bytes:
            break
    return best


def positional_encoding(x: jnp.ndarray,
                        pe: jnp.ndarray,
                        *,
                        dropout_p: float = 0.0,
                        training: bool = False,
                        rng_key=None,
                        seq_tile: int | None = None) -> jnp.ndarray:
    """x: (B, S, D);  pe: (seq_len, D) with seq_len >= S."""
    B, S, D = x.shape
    pe_sliced = pe[:S, :].astype(x.dtype)        # mirrors self.pe[:, :x.shape[1], :]

    apply_dropout = bool(training) and dropout_p > 0.0
    if apply_dropout:
        if rng_key is None:
            rng_key = jax.random.PRNGKey(0)
        bits = jax.random.bits(rng_key, (B, S, D), dtype=jnp.uint32)
        threshold = min(int(round(dropout_p * 2.0 ** 32)), (1 << 32) - 1)
        scale = 1.0 / (1.0 - dropout_p)
        kernel = functools.partial(_pe_add_dropout_kernel,
                                   threshold=threshold, scale=scale)
    else:
        kernel = _pe_add_kernel

    lane_dense = (D % 128 == 0)

    if lane_dense:
        # 3-D path: tile the sequence axis; ~1 MiB blocks, S-tile is the slow
        # grid axis so the PE block DMA is reused across the inner batch loop.
        ts = seq_tile if seq_tile is not None else _choose_seq_tile(S, D, x.dtype.itemsize)
        assert S % ts == 0 and (ts % 8 == 0 or ts == S), "bad sequence tile"
        grid = (S // ts, B)
        row_spec = pl.BlockSpec((None, ts, D), lambda s, b: (b, s, 0))
        pe_spec = pl.BlockSpec((ts, D), lambda s, b: (s, 0))
        in_specs = [row_spec, pe_spec]
        operands = [x, pe_sliced]
        if apply_dropout:
            in_specs.append(pl.BlockSpec((None, ts, D), lambda s, b: (b, s, 0)))
            operands.append(bits)
        out_spec = pl.BlockSpec((None, ts, D), lambda s, b: (b, s, 0))
        out_shape = jax.ShapeDtypeStruct((B, S, D), x.dtype)
    else:
        # Lane-dense fallback for small / non-multiple-of-128 d_model: flatten
        # (S, D) into one lane axis so stores are unmasked full-lane vst.
        # TODO(synk): if S*D itself grows huge while D < 128, chunk the flat axis.
        F = S * D
        xr = x.reshape(B, 1, F)
        per = pe_sliced.reshape(1, F)
        grid = (B,)
        row_spec = pl.BlockSpec((None, 1, F), lambda b: (b, 0, 0))
        pe_spec = pl.BlockSpec((1, F), lambda b: (0, 0))   # block idx constant -> DMA'd once
        in_specs = [row_spec, pe_spec]
        operands = [xr, per]
        if apply_dropout:
            in_specs.append(pl.BlockSpec((None, 1, F), lambda b: (b, 0, 0)))
            operands.append(bits.reshape(B, 1, F))
        out_spec = pl.BlockSpec((None, 1, F), lambda b: (b, 0, 0))
        out_shape = jax.ShapeDtypeStruct((B, 1, F), x.dtype)

    out = pl.pallas_call(
        kernel,
        out_shape=out_shape,
        grid=grid,
        in_specs=in_specs,
        out_specs=out_spec,
        compiler_params=pltpu.CompilerParams(
            # No sequential in-kernel state (dropout bits come from HBM), so all
            # grid axes are parallel; enables v7x megacore sharding, free on v5e/v6e.
            dimension_semantics=("parallel",) * len(grid)),
    )(*operands)

    return out if lane_dense else out.reshape(B, S, D)


# ------------------------------- demo -----------------------------------------

if __name__ == "__main__":
    # Shapes consistent with the module: batch=2, seq=8, d_model=32.
    B, S, D = 2, 8, 32
    dropout_rate = 0.1

    root = jax.random.PRNGKey(0)
    kx, kd, kx2, kd2 = jax.random.split(root, 4)
    x = jax.random.normal(kx, (B, S, D), dtype=jnp.float32)
    pe = make_pe_table(S, D)
    ref = x + pe[None, :S, :]

    # Eval mode (dropout is identity) — deterministic; check against reference.
    out_eval = jax.block_until_ready(
        positional_encoding(x, pe, dropout_p=dropout_rate, training=False))
    assert out_eval.shape == (B, S, D)
    assert jnp.allclose(out_eval, ref, atol=1e-6), "eval-mode mismatch vs reference"

    # Training mode — every output element must be 0 or (x+pe)/(1-p).
    out_train = jax.block_until_ready(
        positional_encoding(x, pe, dropout_p=dropout_rate, training=True, rng_key=kd))
    scaled = ref * (1.0 / (1.0 - dropout_rate))
    ok = jnp.isclose(out_train, scaled, rtol=1e-5, atol=1e-5) | (out_train == 0.0)
    assert bool(jnp.all(ok)), "training-mode dropout values out of spec"

    # Also exercise the lane-dense, sequence-tiled path (D multiple of 128,
    # several S tiles) at a still-small shape.
    B2, S2, D2 = 2, 64, 128
    x2 = jax.random.normal(kx2, (B2, S2, D2), dtype=jnp.float32)
    pe2 = make_pe_table(S2, D2)
    ref2 = x2 + pe2[None, :, :]

    out2 = jax.block_until_ready(
        positional_encoding(x2, pe2, dropout_p=0.0, training=False, seq_tile=16))
    assert jnp.allclose(out2, ref2, atol=1e-6), "tiled-path mismatch vs reference"

    p2 = 0.25
    out2_train = jax.block_until_ready(
        positional_encoding(x2, pe2, dropout_p=p2, training=True, rng_key=kd2,
                            seq_tile=16))
    scaled2 = ref2 * (1.0 / (1.0 - p2))
    ok2 = jnp.isclose(out2_train, scaled2, rtol=1e-5, atol=1e-5) | (out2_train == 0.0)
    assert bool(jnp.all(ok2)), "tiled-path dropout values out of spec"

    print("KERNEL_OK")
</pallas_src>

<mosaic_0001>
module attributes {stable_mosaic.version = 11 : i64} {
  func.func @_pe_add_kernel(%arg0: i32, %arg1: memref<1x1x256xf32, #tpu.memory_space<vmem>>, %arg2: memref<1x256xf32, #tpu.memory_space<vmem>>, %arg3: memref<1x1x256xf32, #tpu.memory_space<vmem>>) attributes {dimension_semantics = [#tpu.dimension_semantics<parallel>], iteration_bounds = array<i64: 2>, scalar_prefetch = 0 : i64, scratch_operands = 0 : i64, tpu.core_type = #tpu.core_type<tc>, window_params = [{transform_indices = @transform_0, window_bounds = array<i64: 1, 1, 256>}, {pipeline_mode = #tpu.pipeline_mode<synchronous>, transform_indices = @transform_1, window_bounds = array<i64: 1, 256>}, {transform_indices = @transform_2, window_bounds = array<i64: 1, 1, 256>}]} {
    %c0 = arith.constant 0 : index
    %c0_0 = arith.constant 0 : index
    %c0_1 = arith.constant 0 : index
    %0 = vector.load %arg1[%c0, %c0_0, %c0_1] : memref<1x1x256xf32, #tpu.memory_space<vmem>>, vector<1x1x256xf32>
    %1 = vector.shape_cast %0 : vector<1x1x256xf32> to vector<1x256xf32>
    %c0_2 = arith.constant 0 : index
    %c0_3 = arith.constant 0 : index
    %2 = vector.load %arg2[%c0_2, %c0_3] : memref<1x256xf32, #tpu.memory_space<vmem>>, vector<1x256xf32>
    %3 = arith.addf %1, %2 : vector<1x256xf32>
    %c0_4 = arith.constant 0 : index
    %c0_5 = arith.constant 0 : index
    %c0_6 = arith.constant 0 : index
    %4 = vector.load %arg3[%c0_4, %c0_5, %c0_6] : memref<1x1x256xf32, #tpu.memory_space<vmem>>, vector<1x1x256xf32>
    %5 = vector.shape_cast %4 : vector<1x1x256xf32> to vector<1x256xf32>
    %6 = vector.shape_cast %3 : vector<1x256xf32> to vector<1x1x256xf32>
    tpu.vector_store %arg3[%c0_4, %c0_5, %c0_6], %6 {strides = array<i32>} : memref<1x1x256xf32, #tpu.memory_space<vmem>>, vector<1x1x256xf32>,
    return
  }
  func.func @transform_0(%arg0: i32) -> (i32, i32, i32) {
    %c0_i32 = arith.constant 0 : i32
    %c0_i32_0 = arith.constant 0 : i32
    %c0_i32_1 = arith.constant 0 : i32
    return %arg0, %c0_i32, %c0_i32_0 : i32, i32, i32
  }
  func.func @transform_1(%arg0: i32) -> (i32, i32) {
    %c0_i32 = arith.constant 0 : i32
    %c0_i32_0 = arith.constant 0 : i32
    %c0_i32_1 = arith.constant 0 : i32
    return %c0_i32, %c0_i32_0 : i32, i32
  }
  func.func @transform_2(%arg0: i32) -> (i32, i32, i32) {
    %c0_i32 = arith.constant 0 : i32
    %c0_i32_0 = arith.constant 0 : i32
    %c0_i32_1 = arith.constant 0 : i32
    return %arg0, %c0_i32, %c0_i32_0 : i32, i32, i32
  }
}

</mosaic_0001>

<bundles_post_ra>
// kernel: tpu_custom_call.1
= control target key start
LH: loop header
LB: loop body
LE: loop exit
PB: predicated region body
PF: predicated region fallthrough
CT: control target
= control target key end

     0   :  { %7 = vsyncpa [#allocation3], 0  ;;  %s594_s0 = inlined_call_operand.hbm [shape: f32[2,1,256], index: 0, kind: input, shape index: {}]   ;;  %s595_s1 = inlined_call_operand.vmem [shape: f32[1,256], index: 1, kind: input, shape index: {}]   ;;  %s596_s2 = inlined_call_operand.hbm [shape: f32[2,1,256], index: 2, kind: output, shape index: {}]  }
   0x1   :  { %9 = vsyncpa [#allocation3 + $0x1], 0 }
   0x2   :  { %10 = vsyncpa [#allocation4], 0 }
   0x3   :  { %12 = vsyncpa [#allocation4 + $0x1], 0  ;;  %s430_s9 = smov 0   ;;  %s432_s10 = smov 0  }
   0x4   :  { %s434_s11 = smov 0   ;;  %s436_s12 = smov 0  }
   0x5 LB: > { %s451_s13 = sadd.s32 4294967295, %s411_s12   ;;  %s253_s14 = sadd.s32 4294967294, %s411_s12   ;;  %s411_s12 = sphi %s436_s12, %s611_s12   ;;  %s407_s11 = sphi %s434_s11, %s610_s11   ;;  %s403_s10 = sphi %s432_s10, %s609_s10   ;;  %s399_s9 = sphi %s430_s9, %s608_s9  }
   0x6   : > { %s455_s15 = sadd.s32 1, %s411_s12   ;;  %s25_s16 = sadd.s32 1, %s407_s11 }
   0x7   : > { %s22_s17 = ssub.s32 %s411_s12, %s455_s15  ;;  %p32_p0 = scmp.ne.s32.totalorder %s407_s11, %s403_s10 }
   0x8   : > { %p23_p1 = scmp.eq.s32.totalorder %s22_s17, 0  ;;  %p33_p2 = scmp.eq.s32.totalorder %s411_s12, 0 }
   0x9   : > { %p38_p3 = scmp.ne.s32.totalorder %s403_s10, %s399_s9  ;;  %p39_p4 = scmp.eq.s32.totalorder %s451_s13, 0 }
   0xa   : > { %s467_s18 = scalar_select %p23_p1, %s407_s11, %s25_s16  }
   0xb   : > { %p469_p5 = por %p33_p2, %p32_p0  ;;  %p473_p6 = por %p39_p4, %p38_p3 }
   0xc   : > { %p83_p7 = scmp.eq.s32.totalorder %s451_s13, 1  ;;  %p89_p8 = scmp.eq.s32.totalorder %s253_s14, 1 }
   0xd   : > { %p281_p10 = scmp.lt.s32.totalorder %s411_s12, 2  ;;  %s112_s23 = sand.u32 1, %s407_s11  }
   0xe   : > { %p480_p11 = por %p83_p7, %p32_p0  ;;  %p484_p12 = por %p89_p8, %p38_p3 }
   0xf   : > { %s267_s24 = sshll.u32 %s411_s12, 5  ;;  %s256_s25 = sshll.u32 %s112_s23, 1 }
  0x10   : > { %s600_s21 = scalar_select %p480_p11, 1, 0 }
  0x11   : > { %s601_s22 = scalar_select %p484_p12, 1, 0 }
  0x12   : > { %s493_s28 = scalar_lea.hbm %s594_s0, %s267_s24  ;;  %s116_s29 = scalar_lea.vmem [#allocation2], %s256_s25 }
  0x13   : > { %s124_s30 = sshll.u32 %s116_s29, 4  ;;  %p497_p13 = pnand %p281_p10, %p469_p5  ;;  %s501_s30 = int_to_ptr.vmem [resolvable:$true] %s124_s30 }
  0x14   : > { %s113_s4 = scalar_lea.sflag [#allocation3], %s112_s23  ;;  %s315_s5 = scalar_lea.hbm %s493_s28, 32 }
  0x15   : > { %p316_p2 = scmp.ne.s32.totalorder %s493_s28, %s315_s5  ;;  %p317_p3 = pneg %p497_p13 }
  0x16   : > { %s320_s8 = scalar_lea.hbm %s594_s0, 64  ;;  %p321_p5 = scmp.lt.u32.totalorder %s493_s28, %s594_s0 }
  0x17   : > { %p318_p4 = pnand %p317_p3, %p316_p2  ;;  %p322_p8 = scmp.lt.u32.totalorder %s320_s8, %s315_s5 }
  0x18   : > { %p324_p9 = scmp.lt.u32.totalorder %s315_s5, %s493_s28 }
  0x19   : > { %p319_p7 = pneg %p318_p4  ;;  %p323_p10 = por %p322_p8, %p321_p5 }
  0x1b   : > { %p325_p0 = por %p324_p9, %p323_p10 }
  0x1d   : > { %p326_p1 = pnand %p325_p0, %p319_p7 }
  0x1f   : > { %329 = shalt.err (!%p326_p1)
}
  0x20   : > { %s330_s17 = scalar_lea.vmem %s501_s30, 32  ;;  %s413_s19 = smov [#allocation2]  }
  0x21   : > { %p331_p2 = scmp.ne.s32.totalorder %s501_s30, %s330_s17  ;;  %s335_s23 = sshll.u32 %s413_s19, 4  ;;  %s336_s23 = int_to_ptr.vmem [resolvable:$false] %s335_s23 }
  0x22   : > { %s337_s24 = scalar_lea.vmem %s336_s23, 64  ;;  %p338_p11 = scmp.lt.s32.totalorder %s501_s30, %s336_s23 }
  0x23   : > { %p333_p4 = pnand %p331_p2, %p317_p3  ;;  %p339_p5 = scmp.lt.s32.totalorder %s337_s24, %s330_s17 }
  0x25   : > { %p334_p12 = pneg %p333_p4  ;;  %p340_p8 = por %p339_p5, %p338_p11 }
  0x27   : > { %p341_p9 = pnand %p340_p8, %p334_p12 }
  0x29   : > { %344 = shalt.err (!%p341_p9)
}
  0x2a   : > { %276 = dma.hbm_to_vmem [thread:$0]  (!%p497_p13), %s493_s28, 32, %s501_s30, %s113_s4  }
  0x2b   : > { %p603_p0 = scmp.lt.s32.totalorder %s411_s12, 3  ;;  %p604_p1 = scmp.ge.s32.totalorder %s411_s12, 1 }
  0x2d   : > { %p130_p3 = pnand %p604_p1, %p603_p0 }
  0x2e   : > { %s535_s25 = sand.u32 (!%p130_p3), 1, %s403_s10  }
  0x2f   : > { %133 = sbr.rel (%p130_p3) target bundleno = 81 (0x51), region = 28  ;;  %s260_s26 = sshll.u32 (!%p130_p3), %s535_s25, 1 }
  0x30   : > { %s136_s27 = scalar_lea.sflag (!%p130_p3), [#allocation3], %s535_s25  ;;  %s139_s29 = scalar_lea.vmem (!%p130_p3), [#allocation2], %s260_s26 }
  0x36   : > { %390 = dma.done.wait (%p473_p6), %s136_s27, 32  }
  0x37   : > { %392 = vsyncadd (%p473_p6), %s136_s27, 4294967264  ;;  %v163_v0 = vlaneseq  ;;  %s159_s28 = scalar_lea.vmem [#allocation5], %s260_s26  ;;  %s268_s3 = sshll.u32 %s451_s13, 5  ;;  %v160_v1 = vld [vmem:[%s139_s29] sm:$0x3] }
  0x38   : > { %s183_s30 = sshll.u32 %s159_s28, 4  ;;  %v161_v2 = vld [vmem:[%s595_s1] sm:$0x3]  ;;  %s552_s20 = scalar_lea.hbm %s596_s2, %s268_s3  ;;  %s547_s30 = int_to_ptr.vmem [resolvable:$true] %s183_s30 }
  0x39   : > { %vm165_vm0 = vcmp.lt.s32.totalorder %v163_v0, 256  ;;  %v162_v3 = vadd.f32 %v161_v2, %v160_v1  ;;  %s169_s8 = scalar_lea.sflag [#allocation4], %s535_s25  ;;  %s345_s13 = scalar_lea.vmem %s547_s30, 32 }
  0x3a   : > { %p346_p6 = scmp.ne.s32.totalorder %s547_s30, %s345_s13  ;;  %p605_p11 = scmp.ne.s32.totalorder %s600_s21, 0 }
  0x3b   : > { %167 = vst.msk [vmem:[%s159_s28] sm:$0x3] %vm165_vm0, %v162_v3  ;;  %s414_s14 = smov [#allocation5]  }
  0x3c   : > { %p347_p12 = pnand %p346_p6, %p605_p11  ;;  %s349_s16 = sshll.u32 %s414_s14, 4  ;;  %s350_s16 = int_to_ptr.vmem [resolvable:$false] %s349_s16 }
  0x3d   : > { %s351_s17 = scalar_lea.vmem %s350_s16, 64  ;;  %p352_p7 = scmp.lt.s32.totalorder %s547_s30, %s350_s16 }
  0x3e   : > { %p348_p13 = pneg %p347_p12  ;;  %p353_p10 = scmp.lt.s32.totalorder %s351_s17, %s345_s13 }
  0x40   : > { %p354_p2 = por %p353_p10, %p352_p7 }
  0x42   : > { %p355_p4 = pnand %p354_p2, %p348_p13 }
  0x44   : > { %358 = shalt.err (!%p355_p4)
}
  0x45   : > { %s359_s19 = scalar_lea.hbm %s552_s20, 32  ;;  %s363_s25 = scalar_lea.hbm %s596_s2, 64 }
  0x46   : > { %p360_p5 = scmp.ne.s32.totalorder %s552_s20, %s359_s19  ;;  %p364_p0 = scmp.lt.u32.totalorder %s552_s20, %s596_s2 }
  0x47   : > { %p365_p1 = scmp.lt.u32.totalorder %s363_s25, %s359_s19  ;;  %p367_p6 = scmp.lt.u32.totalorder %s359_s19, %s552_s20 }
  0x48   : > { %p361_p8 = pnand %p360_p5, %p605_p11 }
  0x49   : > { %p366_p3 = por %p365_p1, %p364_p0 }
  0x4a   : > { %p362_p9 = pneg %p361_p8 }
  0x4b   : > { %p368_p12 = por %p367_p6, %p366_p3 }
  0x4d   : > { %p369_p13 = pnand %p368_p12, %p362_p9 }
  0x4f   : > { %372 = shalt.err (!%p369_p13)
}
  0x50   : > { %271 = dma.vmem_to_hbm [thread:$0]  (%p605_p11), %s547_s30, 32, %s552_s20, %s169_s8  }
  0x51 PF: > { %s195_s29 = sand.u32 1, %s399_s9   ;;  %p606_p7 = scmp.ne.s32.totalorder %s601_s22, 0 }
  0x52   : > { %p607_p10 = scmp.ge.s32.totalorder %s411_s12, 2  ;;  %s196_s28 = scalar_lea.sflag [#allocation4], %s195_s29 }
  0x54   : > { %p278_p2 = pnand %p607_p10, %p606_p7 }
  0x56   : > { %394 = dma.done.wait (!%p278_p2), %s196_s28, 32  }
  0x57   : > { %396 = vsyncadd (!%p278_p2), %s196_s28, 4294967264  ;;  %p15_p4 = scmp.ge.s32.totalorder %s455_s15, 4   ;;  %s608_s9 = smov %s403_s10 }
  0x58   : > { %s609_s10 = smov %s407_s11  ;;  %s610_s11 = smov %s467_s18 }
  0x59   : > { %s611_s12 = smov %s455_s15  ;;  %17 = sbr.rel (!%p15_p4) target bundleno = 5 (0x5), region = 73 }
  0x60   :  { %201 = vsyncpa [#allocation3], 1 }
  0x61   :  { %203 = vsyncpa [#allocation3 + $0x1], 1 }
  0x62   :  { %204 = vsyncpa [#allocation4], 1 }
  0x63   :  { %206 = vsyncpa [#allocation4 + $0x1], 1 }

</bundles_post_ra>
